<compile_context>
chip_gen: v6e
topology: v6e:2x2x1
jax: 0.10.0
libtpu: 0.0.40
codegen_flags: <defaults>
</compile_context>

<pallas_src>
import math

import jax
import jax.numpy as jnp
from jax.experimental import pallas as pl
from jax.experimental.pallas import tpu as pltpu

INPUT_SIZE = 2
HIDDEN_SIZE = 32
OUTPUT_SIZE = 1
NUM_SOMA_GROUPS = 2


# --------------------------------------------------------------------------
# Pallas kernel: full recurrent unroll over time for one batch block.
# --------------------------------------------------------------------------
def snn_kernel(x_ref, w_in_ref, tau_g_ref, tau_s_ref, w_out_ref, b_out_ref,
               out_ref):
    Bt, T, I = x_ref.shape
    H = w_in_ref.shape[1]
    O = w_out_ref.shape[0]
    V_TH = 1.0

    # ---- loop invariants (hoisted) ----------------------------------------
    x = x_ref[...].astype(jnp.float32)            # (Bt, T, I)
    w_in = w_in_ref[...]                          # (I, H)
    alpha_g = jax.nn.sigmoid(tau_g_ref[...])      # (1, H) per-group decay
    alpha_s = jax.nn.sigmoid(tau_s_ref[...])      # (1, H) soma-integration decay
    one_m_ag = 1.0 - alpha_g
    one_m_as = 1.0 - alpha_s

    # ---- input projection hoisted out of the recurrence --------------------
    # g_all[b, t, h] = sum_i x[b, t, i] * w_in[i, h].  I is tiny (2), so a
    # couple of VPU FMAs replace T small MXU matmuls on the serial chain.
    g_all = x[:, :, 0:1] * w_in[0][None, None, :]           # (Bt, T, H)
    for i in range(1, I):
        g_all = g_all + x[:, :, i:i + 1] * w_in[i][None, None, :]

    decision_start = max(T - T // 4, T // 2)                 # static Python int

    zeros = jnp.zeros((Bt, H), jnp.float32)
    pot_g = zeros
    spk_g = zeros
    pot_s = zeros
    spk_s = zeros
    acc = zeros

    # ---- recurrence: fully unrolled, split at decision_start ---------------
    # No per-step jnp.where / zeros broadcast; accumulation only happens in
    # the decision window (decided at trace time).
    # TODO(synk): for long sequences, chunk T via an "arbitrary" grid axis and
    # carry pot/spk state in VMEM scratch instead of a full unroll.
    for t in range(T):
        g_in = g_all[:, t, :]                                # static slice (Bt, H)
        pot_g = alpha_g * pot_g + one_m_ag * g_in - V_TH * spk_g
        spk_g = (pot_g - V_TH > 0.0).astype(jnp.float32)
        pot_s = alpha_s * pot_s + one_m_as * spk_g - V_TH * spk_s
        spk_s = (pot_s - V_TH > 0.0).astype(jnp.float32)
        if t >= decision_start:
            acc = acc + spk_s

    # ---- output projection --------------------------------------------------
    if O == 1:
        # (Bt, H) * (1, H) -> lane reduce: VPU mul + XLU reduce, no MXU.
        out = jnp.sum(acc * w_out_ref[...], axis=-1, keepdims=True)
    else:
        out = jnp.dot(acc, w_out_ref[...].T, preferred_element_type=jnp.float32)
    out_ref[...] = out + b_out_ref[...]


# --------------------------------------------------------------------------
# Wrapper: parameter plumbing + pallas_call
# --------------------------------------------------------------------------
def sh_snn_forward(x, w_in, tau_g, tau_s, w_out, b_out, *, b_tile=None):
    """x: (B, T, I) float32, w_out: (O, H), b_out: (1, O) -> (B, O) float32."""
    B, T, I = x.shape
    H = w_in.shape[1]
    O = w_out.shape[0]

    # Optional batch tiling (useful on v7x megacore for large B).  Block last
    # two dims of the output are (b_tile, O); when b_tile < B it must be a
    # multiple of 8 to satisfy the (8, 128) block rule.
    if b_tile is None:
        b_tile = B
    if b_tile != B and (B % b_tile != 0 or b_tile % 8 != 0):
        b_tile = B
    grid = (B // b_tile,)

    x = x.astype(jnp.float32)

    return pl.pallas_call(
        snn_kernel,
        out_shape=jax.ShapeDtypeStruct((B, O), jnp.float32),
        grid=grid,
        in_specs=[
            pl.BlockSpec((b_tile, T, I), lambda b: (b, 0, 0)),
            pl.BlockSpec((I, H), lambda b: (0, 0)),
            pl.BlockSpec((1, H), lambda b: (0, 0)),
            pl.BlockSpec((1, H), lambda b: (0, 0)),
            pl.BlockSpec((O, H), lambda b: (0, 0)),
            pl.BlockSpec((1, O), lambda b: (0, 0)),
        ],
        out_specs=pl.BlockSpec((b_tile, O), lambda b: (b, 0)),
        compiler_params=pltpu.CompilerParams(
            dimension_semantics=("parallel",)),
    )(x, w_in, tau_g, tau_s, w_out, b_out)


# --------------------------------------------------------------------------
# Deterministic parameter init (shapes from the PyTorch __init__)
# --------------------------------------------------------------------------
def init_params(key):
    group_size = HIDDEN_SIZE // NUM_SOMA_GROUPS
    ks = jax.random.split(key, 7)
    b_in = 1.0 / math.sqrt(INPUT_SIZE)
    # layer.Linear(input_size, group_size, bias=False): weight (group_size, I)
    w_g0 = jax.random.uniform(ks[0], (group_size, INPUT_SIZE), jnp.float32,
                              -b_in, b_in)
    w_g1 = jax.random.uniform(ks[1], (group_size, INPUT_SIZE), jnp.float32,
                              -b_in, b_in)
    # tau_m_groups: (num_groups, group_size); row0 ~ U(1,3), row1 ~ U(-1,1)
    tau0 = jax.random.uniform(ks[2], (group_size,), jnp.float32, 1.0, 3.0)
    tau1 = jax.random.uniform(ks[3], (group_size,), jnp.float32, -1.0, 1.0)
    # soma_integration_tau: (hidden,) ~ U(0,2)
    tau_soma = jax.random.uniform(ks[4], (HIDDEN_SIZE,), jnp.float32, 0.0, 2.0)
    # output layer: weight (O, H), bias (O,)
    b_out_bound = 1.0 / math.sqrt(HIDDEN_SIZE)
    w_out = jax.random.uniform(ks[5], (OUTPUT_SIZE, HIDDEN_SIZE), jnp.float32,
                               -b_out_bound, b_out_bound)
    b_out = jax.random.uniform(ks[6], (OUTPUT_SIZE,), jnp.float32,
                               -b_out_bound, b_out_bound)

    # Fuse the two group layers / taus along the hidden axis (== torch.cat
    # order); the group dynamics are elementwise per neuron so this is exact.
    w_in = jnp.concatenate([w_g0.T, w_g1.T], axis=1)               # (I, H)
    tau_g = jnp.concatenate([tau0, tau1]).reshape(1, HIDDEN_SIZE)  # (1, H)
    tau_s = tau_soma.reshape(1, HIDDEN_SIZE)                       # (1, H)
    b_out2 = b_out.reshape(1, OUTPUT_SIZE)                         # (1, O)
    return w_in, tau_g, tau_s, w_out, b_out2


# --------------------------------------------------------------------------
# Pure-JAX reference (mirrors the PyTorch forward) for a correctness check
# --------------------------------------------------------------------------
def reference_forward(x, w_in, tau_g, tau_s, w_out, b_out):
    B, T, I = x.shape
    H = w_in.shape[1]
    alpha_g = jax.nn.sigmoid(tau_g)
    alpha_s = jax.nn.sigmoid(tau_s)
    pot_g = jnp.zeros((B, H)); spk_g = jnp.zeros((B, H))
    pot_s = jnp.zeros((B, H)); spk_s = jnp.zeros((B, H))
    outs = []
    for t in range(T):
        g_in = x[:, t, :] @ w_in
        pot_g = alpha_g * pot_g + (1 - alpha_g) * g_in - spk_g
        spk_g = (pot_g - 1.0 > 0).astype(jnp.float32)
        pot_s = alpha_s * pot_s + (1 - alpha_s) * spk_g - spk_s
        spk_s = (pot_s - 1.0 > 0).astype(jnp.float32)
        outs.append(spk_s)
    decision_start = max(T - T // 4, T // 2)
    acc = jnp.stack(outs[decision_start:], axis=1).sum(axis=1)
    return acc @ w_out.T + b_out


if __name__ == "__main__":
    key = jax.random.PRNGKey(0)
    k_param, k_x = jax.random.split(key)

    B, T = 2, 8
    # DelayedXOR-style input: (batch, seq_len, input_size=2)
    x = jax.random.uniform(k_x, (B, T, INPUT_SIZE), jnp.float32, 0.0, 1.0)

    params = init_params(k_param)

    out = sh_snn_forward(x, *params)
    out = jax.block_until_ready(out)

    ref = reference_forward(x, *params)
    assert out.shape == (B, OUTPUT_SIZE)
    assert jnp.allclose(out, ref, atol=1e-5, rtol=1e-5), (out, ref)

    print("KERNEL_OK")
</pallas_src>

<mosaic_0001>
module attributes {stable_mosaic.version = 11 : i64} {
  func.func @snn_kernel(%arg0: i32, %arg1: memref<2x8x2xf32, #tpu.memory_space<vmem>>, %arg2: memref<2x32xf32, #tpu.memory_space<vmem>>, %arg3: memref<1x32xf32, #tpu.memory_space<vmem>>, %arg4: memref<1x32xf32, #tpu.memory_space<vmem>>, %arg5: memref<1x32xf32, #tpu.memory_space<vmem>>, %arg6: memref<1x1xf32, #tpu.memory_space<vmem>>, %arg7: memref<2x1xf32, #tpu.memory_space<vmem>>) attributes {dimension_semantics = [#tpu.dimension_semantics<parallel>], iteration_bounds = array<i64: 1>, scalar_prefetch = 0 : i64, scratch_operands = 0 : i64, tpu.core_type = #tpu.core_type<tc>, window_params = [{transform_indices = @transform_0, window_bounds = array<i64: 2, 8, 2>}, {pipeline_mode = #tpu.pipeline_mode<synchronous>, transform_indices = @transform_1, window_bounds = array<i64: 2, 32>}, {pipeline_mode = #tpu.pipeline_mode<synchronous>, transform_indices = @transform_2, window_bounds = array<i64: 1, 32>}, {pipeline_mode = #tpu.pipeline_mode<synchronous>, transform_indices = @transform_3, window_bounds = array<i64: 1, 32>}, {pipeline_mode = #tpu.pipeline_mode<synchronous>, transform_indices = @transform_4, window_bounds = array<i64: 1, 32>}, {pipeline_mode = #tpu.pipeline_mode<synchronous>, transform_indices = @transform_5, window_bounds = array<i64: 1, 1>}, {transform_indices = @transform_6, window_bounds = array<i64: 2, 1>}]} {
    %c0 = arith.constant 0 : index
    %c0_0 = arith.constant 0 : index
    %c0_1 = arith.constant 0 : index
    %0 = vector.load %arg1[%c0, %c0_0, %c0_1] : memref<2x8x2xf32, #tpu.memory_space<vmem>>, vector<2x8x2xf32>
    %c0_2 = arith.constant 0 : index
    %c0_3 = arith.constant 0 : index
    %1 = vector.load %arg2[%c0_2, %c0_3] : memref<2x32xf32, #tpu.memory_space<vmem>>, vector<2x32xf32>
    %c0_4 = arith.constant 0 : index
    %c0_5 = arith.constant 0 : index
    %2 = vector.load %arg3[%c0_4, %c0_5] : memref<1x32xf32, #tpu.memory_space<vmem>>, vector<1x32xf32>
    %3 = arith.negf %2 : vector<1x32xf32>
    %4 = math.exp %3 : vector<1x32xf32>
    %cst = arith.constant 1.000000e+00 : f32
    %5 = vector.broadcast %cst : f32 to vector<1x32xf32>
    %6 = arith.addf %5, %4 : vector<1x32xf32>
    %7 = arith.divf %5, %6 : vector<1x32xf32>
    %c0_6 = arith.constant 0 : index
    %c0_7 = arith.constant 0 : index
    %8 = vector.load %arg4[%c0_6, %c0_7] : memref<1x32xf32, #tpu.memory_space<vmem>>, vector<1x32xf32>
    %9 = arith.negf %8 : vector<1x32xf32>
    %10 = math.exp %9 : vector<1x32xf32>
    %cst_8 = arith.constant 1.000000e+00 : f32
    %11 = vector.broadcast %cst_8 : f32 to vector<1x32xf32>
    %12 = arith.addf %11, %10 : vector<1x32xf32>
    %13 = arith.divf %11, %12 : vector<1x32xf32>
    %cst_9 = arith.constant 1.000000e+00 : f32
    %14 = vector.broadcast %cst_9 : f32 to vector<1x32xf32>
    %15 = arith.subf %14, %7 : vector<1x32xf32>
    %cst_10 = arith.constant 1.000000e+00 : f32
    %16 = vector.broadcast %cst_10 : f32 to vector<1x32xf32>
    %17 = arith.subf %16, %13 : vector<1x32xf32>
    %18 = vector.extract_strided_slice %0 {offsets = [0, 0, 0], sizes = [2, 8, 1], strides = [1, 1, 1]} : vector<2x8x2xf32> to vector<2x8x1xf32>
    %19 = vector.extract_strided_slice %1 {offsets = [0, 0], sizes = [1, 32], strides = [1, 1]} : vector<2x32xf32> to vector<1x32xf32>
    %20 = vector.shape_cast %19 : vector<1x32xf32> to vector<32xf32>
    %21 = vector.shape_cast %20 : vector<32xf32> to vector<1x1x32xf32>
    %22 = vector.broadcast %18 : vector<2x8x1xf32> to vector<2x8x32xf32>
    %23 = vector.broadcast %21 : vector<1x1x32xf32> to vector<2x8x32xf32>
    %24 = arith.mulf %22, %23 : vector<2x8x32xf32>
    %25 = vector.extract_strided_slice %0 {offsets = [0, 0, 1], sizes = [2, 8, 1], strides = [1, 1, 1]} : vector<2x8x2xf32> to vector<2x8x1xf32>
    %26 = vector.extract_strided_slice %1 {offsets = [1, 0], sizes = [1, 32], strides = [1, 1]} : vector<2x32xf32> to vector<1x32xf32>
    %27 = vector.shape_cast %26 : vector<1x32xf32> to vector<32xf32>
    %28 = vector.shape_cast %27 : vector<32xf32> to vector<1x1x32xf32>
    %29 = vector.broadcast %25 : vector<2x8x1xf32> to vector<2x8x32xf32>
    %30 = vector.broadcast %28 : vector<1x1x32xf32> to vector<2x8x32xf32>
    %31 = arith.mulf %29, %30 : vector<2x8x32xf32>
    %32 = arith.addf %24, %31 : vector<2x8x32xf32>
    %cst_11 = arith.constant 0.000000e+00 : f32
    %33 = vector.broadcast %cst_11 : f32 to vector<2x32xf32>
    %34 = vector.extract_strided_slice %32 {offsets = [0, 0, 0], sizes = [2, 1, 32], strides = [1, 1, 1]} : vector<2x8x32xf32> to vector<2x1x32xf32>
    %35 = vector.shape_cast %34 : vector<2x1x32xf32> to vector<2x32xf32>
    %36 = vector.broadcast %7 : vector<1x32xf32> to vector<2x32xf32>
    %37 = arith.mulf %36, %33 : vector<2x32xf32>
    %38 = vector.broadcast %15 : vector<1x32xf32> to vector<2x32xf32>
    %39 = arith.mulf %38, %35 : vector<2x32xf32>
    %40 = arith.addf %37, %39 : vector<2x32xf32>
    %cst_12 = arith.constant 1.000000e+00 : f32
    %41 = vector.broadcast %cst_12 : f32 to vector<2x32xf32>
    %42 = arith.mulf %41, %33 : vector<2x32xf32>
    %43 = arith.subf %40, %42 : vector<2x32xf32>
    %cst_13 = arith.constant 1.000000e+00 : f32
    %44 = vector.broadcast %cst_13 : f32 to vector<2x32xf32>
    %45 = arith.subf %43, %44 : vector<2x32xf32>
    %cst_14 = arith.constant 0.000000e+00 : f32
    %46 = vector.broadcast %cst_14 : f32 to vector<2x32xf32>
    %47 = arith.cmpf ogt, %45, %46 : vector<2x32xf32>
    %48 = arith.extui %47 : vector<2x32xi1> to vector<2x32xi32>
    %49 = arith.sitofp %48 : vector<2x32xi32> to vector<2x32xf32>
    %50 = vector.broadcast %13 : vector<1x32xf32> to vector<2x32xf32>
    %51 = arith.mulf %50, %33 : vector<2x32xf32>
    %52 = vector.broadcast %17 : vector<1x32xf32> to vector<2x32xf32>
    %53 = arith.mulf %52, %49 : vector<2x32xf32>
    %54 = arith.addf %51, %53 : vector<2x32xf32>
    %cst_15 = arith.constant 1.000000e+00 : f32
    %55 = vector.broadcast %cst_15 : f32 to vector<2x32xf32>
    %56 = arith.mulf %55, %33 : vector<2x32xf32>
    %57 = arith.subf %54, %56 : vector<2x32xf32>
    %cst_16 = arith.constant 1.000000e+00 : f32
    %58 = vector.broadcast %cst_16 : f32 to vector<2x32xf32>
    %59 = arith.subf %57, %58 : vector<2x32xf32>
    %cst_17 = arith.constant 0.000000e+00 : f32
    %60 = vector.broadcast %cst_17 : f32 to vector<2x32xf32>
    %61 = arith.cmpf ogt, %59, %60 : vector<2x32xf32>
    %62 = arith.extui %61 : vector<2x32xi1> to vector<2x32xi32>
    %63 = arith.sitofp %62 : vector<2x32xi32> to vector<2x32xf32>
    %64 = vector.extract_strided_slice %32 {offsets = [0, 1, 0], sizes = [2, 1, 32], strides = [1, 1, 1]} : vector<2x8x32xf32> to vector<2x1x32xf32>
    %65 = vector.shape_cast %64 : vector<2x1x32xf32> to vector<2x32xf32>
    %66 = vector.broadcast %7 : vector<1x32xf32> to vector<2x32xf32>
    %67 = arith.mulf %66, %43 : vector<2x32xf32>
    %68 = vector.broadcast %15 : vector<1x32xf32> to vector<2x32xf32>
    %69 = arith.mulf %68, %65 : vector<2x32xf32>
    %70 = arith.addf %67, %69 : vector<2x32xf32>
    %cst_18 = arith.constant 1.000000e+00 : f32
    %71 = vector.broadcast %cst_18 : f32 to vector<2x32xf32>
    %72 = arith.mulf %71, %49 : vector<2x32xf32>
    %73 = arith.subf %70, %72 : vector<2x32xf32>
    %cst_19 = arith.constant 1.000000e+00 : f32
    %74 = vector.broadcast %cst_19 : f32 to vector<2x32xf32>
    %75 = arith.subf %73, %74 : vector<2x32xf32>
    %cst_20 = arith.constant 0.000000e+00 : f32
    %76 = vector.broadcast %cst_20 : f32 to vector<2x32xf32>
    %77 = arith.cmpf ogt, %75, %76 : vector<2x32xf32>
    %78 = arith.extui %77 : vector<2x32xi1> to vector<2x32xi32>
    %79 = arith.sitofp %78 : vector<2x32xi32> to vector<2x32xf32>
    %80 = vector.broadcast %13 : vector<1x32xf32> to vector<2x32xf32>
    %81 = arith.mulf %80, %57 : vector<2x32xf32>
    %82 = vector.broadcast %17 : vector<1x32xf32> to vector<2x32xf32>
    %83 = arith.mulf %82, %79 : vector<2x32xf32>
    %84 = arith.addf %81, %83 : vector<2x32xf32>
    %cst_21 = arith.constant 1.000000e+00 : f32
    %85 = vector.broadcast %cst_21 : f32 to vector<2x32xf32>
    %86 = arith.mulf %85, %63 : vector<2x32xf32>
    %87 = arith.subf %84, %86 : vector<2x32xf32>
    %cst_22 = arith.constant 1.000000e+00 : f32
    %88 = vector.broadcast %cst_22 : f32 to vector<2x32xf32>
    %89 = arith.subf %87, %88 : vector<2x32xf32>
    %cst_23 = arith.constant 0.000000e+00 : f32
    %90 = vector.broadcast %cst_23 : f32 to vector<2x32xf32>
    %91 = arith.cmpf ogt, %89, %90 : vector<2x32xf32>
    %92 = arith.extui %91 : vector<2x32xi1> to vector<2x32xi32>
    %93 = arith.sitofp %92 : vector<2x32xi32> to vector<2x32xf32>
    %94 = vector.extract_strided_slice %32 {offsets = [0, 2, 0], sizes = [2, 1, 32], strides = [1, 1, 1]} : vector<2x8x32xf32> to vector<2x1x32xf32>
    %95 = vector.shape_cast %94 : vector<2x1x32xf32> to vector<2x32xf32>
    %96 = vector.broadcast %7 : vector<1x32xf32> to vector<2x32xf32>
    %97 = arith.mulf %96, %73 : vector<2x32xf32>
    %98 = vector.broadcast %15 : vector<1x32xf32> to vector<2x32xf32>
    %99 = arith.mulf %98, %95 : vector<2x32xf32>
    %100 = arith.addf %97, %99 : vector<2x32xf32>
    %cst_24 = arith.constant 1.000000e+00 : f32
    %101 = vector.broadcast %cst_24 : f32 to vector<2x32xf32>
    %102 = arith.mulf %101, %79 : vector<2x32xf32>
    %103 = arith.subf %100, %102 : vector<2x32xf32>
    %cst_25 = arith.constant 1.000000e+00 : f32
    %104 = vector.broadcast %cst_25 : f32 to vector<2x32xf32>
    %105 = arith.subf %103, %104 : vector<2x32xf32>
    %cst_26 = arith.constant 0.000000e+00 : f32
    %106 = vector.broadcast %cst_26 : f32 to vector<2x32xf32>
    %107 = arith.cmpf ogt, %105, %106 : vector<2x32xf32>
    %108 = arith.extui %107 : vector<2x32xi1> to vector<2x32xi32>
    %109 = arith.sitofp %108 : vector<2x32xi32> to vector<2x32xf32>
    %110 = vector.broadcast %13 : vector<1x32xf32> to vector<2x32xf32>
    %111 = arith.mulf %110, %87 : vector<2x32xf32>
    %112 = vector.broadcast %17 : vector<1x32xf32> to vector<2x32xf32>
    %113 = arith.mulf %112, %109 : vector<2x32xf32>
    %114 = arith.addf %111, %113 : vector<2x32xf32>
    %cst_27 = arith.constant 1.000000e+00 : f32
    %115 = vector.broadcast %cst_27 : f32 to vector<2x32xf32>
    %116 = arith.mulf %115, %93 : vector<2x32xf32>
    %117 = arith.subf %114, %116 : vector<2x32xf32>
    %cst_28 = arith.constant 1.000000e+00 : f32
    %118 = vector.broadcast %cst_28 : f32 to vector<2x32xf32>
    %119 = arith.subf %117, %118 : vector<2x32xf32>
    %cst_29 = arith.constant 0.000000e+00 : f32
    %120 = vector.broadcast %cst_29 : f32 to vector<2x32xf32>
    %121 = arith.cmpf ogt, %119, %120 : vector<2x32xf32>
    %122 = arith.extui %121 : vector<2x32xi1> to vector<2x32xi32>
    %123 = arith.sitofp %122 : vector<2x32xi32> to vector<2x32xf32>
    %124 = vector.extract_strided_slice %32 {offsets = [0, 3, 0], sizes = [2, 1, 32], strides = [1, 1, 1]} : vector<2x8x32xf32> to vector<2x1x32xf32>
    %125 = vector.shape_cast %124 : vector<2x1x32xf32> to vector<2x32xf32>
    %126 = vector.broadcast %7 : vector<1x32xf32> to vector<2x32xf32>
    %127 = arith.mulf %126, %103 : vector<2x32xf32>
    %128 = vector.broadcast %15 : vector<1x32xf32> to vector<2x32xf32>
    %129 = arith.mulf %128, %125 : vector<2x32xf32>
    %130 = arith.addf %127, %129 : vector<2x32xf32>
    %cst_30 = arith.constant 1.000000e+00 : f32
    %131 = vector.broadcast %cst_30 : f32 to vector<2x32xf32>
    %132 = arith.mulf %131, %109 : vector<2x32xf32>
    %133 = arith.subf %130, %132 : vector<2x32xf32>
    %cst_31 = arith.constant 1.000000e+00 : f32
    %134 = vector.broadcast %cst_31 : f32 to vector<2x32xf32>
    %135 = arith.subf %133, %134 : vector<2x32xf32>
    %cst_32 = arith.constant 0.000000e+00 : f32
    %136 = vector.broadcast %cst_32 : f32 to vector<2x32xf32>
    %137 = arith.cmpf ogt, %135, %136 : vector<2x32xf32>
    %138 = arith.extui %137 : vector<2x32xi1> to vector<2x32xi32>
    %139 = arith.sitofp %138 : vector<2x32xi32> to vector<2x32xf32>
    %140 = vector.broadcast %13 : vector<1x32xf32> to vector<2x32xf32>
    %141 = arith.mulf %140, %117 : vector<2x32xf32>
    %142 = vector.broadcast %17 : vector<1x32xf32> to vector<2x32xf32>
    %143 = arith.mulf %142, %139 : vector<2x32xf32>
    %144 = arith.addf %141, %143 : vector<2x32xf32>
    %cst_33 = arith.constant 1.000000e+00 : f32
    %145 = vector.broadcast %cst_33 : f32 to vector<2x32xf32>
    %146 = arith.mulf %145, %123 : vector<2x32xf32>
    %147 = arith.subf %144, %146 : vector<2x32xf32>
    %cst_34 = arith.constant 1.000000e+00 : f32
    %148 = vector.broadcast %cst_34 : f32 to vector<2x32xf32>
    %149 = arith.subf %147, %148 : vector<2x32xf32>
    %cst_35 = arith.constant 0.000000e+00 : f32
    %150 = vector.broadcast %cst_35 : f32 to vector<2x32xf32>
    %151 = arith.cmpf ogt, %149, %150 : vector<2x32xf32>
    %152 = arith.extui %151 : vector<2x32xi1> to vector<2x32xi32>
    %153 = arith.sitofp %152 : vector<2x32xi32> to vector<2x32xf32>
    %154 = vector.extract_strided_slice %32 {offsets = [0, 4, 0], sizes = [2, 1, 32], strides = [1, 1, 1]} : vector<2x8x32xf32> to vector<2x1x32xf32>
    %155 = vector.shape_cast %154 : vector<2x1x32xf32> to vector<2x32xf32>
    %156 = vector.broadcast %7 : vector<1x32xf32> to vector<2x32xf32>
    %157 = arith.mulf %156, %133 : vector<2x32xf32>
    %158 = vector.broadcast %15 : vector<1x32xf32> to vector<2x32xf32>
    %159 = arith.mulf %158, %155 : vector<2x32xf32>
    %160 = arith.addf %157, %159 : vector<2x32xf32>
    %cst_36 = arith.constant 1.000000e+00 : f32
    %161 = vector.broadcast %cst_36 : f32 to vector<2x32xf32>
    %162 = arith.mulf %161, %139 : vector<2x32xf32>
    %163 = arith.subf %160, %162 : vector<2x32xf32>
    %cst_37 = arith.constant 1.000000e+00 : f32
    %164 = vector.broadcast %cst_37 : f32 to vector<2x32xf32>
    %165 = arith.subf %163, %164 : vector<2x32xf32>
    %cst_38 = arith.constant 0.000000e+00 : f32
    %166 = vector.broadcast %cst_38 : f32 to vector<2x32xf32>
    %167 = arith.cmpf ogt, %165, %166 : vector<2x32xf32>
    %168 = arith.extui %167 : vector<2x32xi1> to vector<2x32xi32>
    %169 = arith.sitofp %168 : vector<2x32xi32> to vector<2x32xf32>
    %170 = vector.broadcast %13 : vector<1x32xf32> to vector<2x32xf32>
    %171 = arith.mulf %170, %147 : vector<2x32xf32>
    %172 = vector.broadcast %17 : vector<1x32xf32> to vector<2x32xf32>
    %173 = arith.mulf %172, %169 : vector<2x32xf32>
    %174 = arith.addf %171, %173 : vector<2x32xf32>
    %cst_39 = arith.constant 1.000000e+00 : f32
    %175 = vector.broadcast %cst_39 : f32 to vector<2x32xf32>
    %176 = arith.mulf %175, %153 : vector<2x32xf32>
    %177 = arith.subf %174, %176 : vector<2x32xf32>
    %cst_40 = arith.constant 1.000000e+00 : f32
    %178 = vector.broadcast %cst_40 : f32 to vector<2x32xf32>
    %179 = arith.subf %177, %178 : vector<2x32xf32>
    %cst_41 = arith.constant 0.000000e+00 : f32
    %180 = vector.broadcast %cst_41 : f32 to vector<2x32xf32>
    %181 = arith.cmpf ogt, %179, %180 : vector<2x32xf32>
    %182 = arith.extui %181 : vector<2x32xi1> to vector<2x32xi32>
    %183 = arith.sitofp %182 : vector<2x32xi32> to vector<2x32xf32>
    %184 = vector.extract_strided_slice %32 {offsets = [0, 5, 0], sizes = [2, 1, 32], strides = [1, 1, 1]} : vector<2x8x32xf32> to vector<2x1x32xf32>
    %185 = vector.shape_cast %184 : vector<2x1x32xf32> to vector<2x32xf32>
    %186 = vector.broadcast %7 : vector<1x32xf32> to vector<2x32xf32>
    %187 = arith.mulf %186, %163 : vector<2x32xf32>
    %188 = vector.broadcast %15 : vector<1x32xf32> to vector<2x32xf32>
    %189 = arith.mulf %188, %185 : vector<2x32xf32>
    %190 = arith.addf %187, %189 : vector<2x32xf32>
    %cst_42 = arith.constant 1.000000e+00 : f32
    %191 = vector.broadcast %cst_42 : f32 to vector<2x32xf32>
    %192 = arith.mulf %191, %169 : vector<2x32xf32>
    %193 = arith.subf %190, %192 : vector<2x32xf32>
    %cst_43 = arith.constant 1.000000e+00 : f32
    %194 = vector.broadcast %cst_43 : f32 to vector<2x32xf32>
    %195 = arith.subf %193, %194 : vector<2x32xf32>
    %cst_44 = arith.constant 0.000000e+00 : f32
    %196 = vector.broadcast %cst_44 : f32 to vector<2x32xf32>
    %197 = arith.cmpf ogt, %195, %196 : vector<2x32xf32>
    %198 = arith.extui %197 : vector<2x32xi1> to vector<2x32xi32>
    %199 = arith.sitofp %198 : vector<2x32xi32> to vector<2x32xf32>
    %200 = vector.broadcast %13 : vector<1x32xf32> to vector<2x32xf32>
    %201 = arith.mulf %200, %177 : vector<2x32xf32>
    %202 = vector.broadcast %17 : vector<1x32xf32> to vector<2x32xf32>
    %203 = arith.mulf %202, %199 : vector<2x32xf32>
    %204 = arith.addf %201, %203 : vector<2x32xf32>
    %cst_45 = arith.constant 1.000000e+00 : f32
    %205 = vector.broadcast %cst_45 : f32 to vector<2x32xf32>
    %206 = arith.mulf %205, %183 : vector<2x32xf32>
    %207 = arith.subf %204, %206 : vector<2x32xf32>
    %cst_46 = arith.constant 1.000000e+00 : f32
    %208 = vector.broadcast %cst_46 : f32 to vector<2x32xf32>
    %209 = arith.subf %207, %208 : vector<2x32xf32>
    %cst_47 = arith.constant 0.000000e+00 : f32
    %210 = vector.broadcast %cst_47 : f32 to vector<2x32xf32>
    %211 = arith.cmpf ogt, %209, %210 : vector<2x32xf32>
    %212 = arith.extui %211 : vector<2x32xi1> to vector<2x32xi32>
    %213 = arith.sitofp %212 : vector<2x32xi32> to vector<2x32xf32>
    %214 = vector.extract_strided_slice %32 {offsets = [0, 6, 0], sizes = [2, 1, 32], strides = [1, 1, 1]} : vector<2x8x32xf32> to vector<2x1x32xf32>
    %215 = vector.shape_cast %214 : vector<2x1x32xf32> to vector<2x32xf32>
    %216 = vector.broadcast %7 : vector<1x32xf32> to vector<2x32xf32>
    %217 = arith.mulf %216, %193 : vector<2x32xf32>
    %218 = vector.broadcast %15 : vector<1x32xf32> to vector<2x32xf32>
    %219 = arith.mulf %218, %215 : vector<2x32xf32>
    %220 = arith.addf %217, %219 : vector<2x32xf32>
    %cst_48 = arith.constant 1.000000e+00 : f32
    %221 = vector.broadcast %cst_48 : f32 to vector<2x32xf32>
    %222 = arith.mulf %221, %199 : vector<2x32xf32>
    %223 = arith.subf %220, %222 : vector<2x32xf32>
    %cst_49 = arith.constant 1.000000e+00 : f32
    %224 = vector.broadcast %cst_49 : f32 to vector<2x32xf32>
    %225 = arith.subf %223, %224 : vector<2x32xf32>
    %cst_50 = arith.constant 0.000000e+00 : f32
    %226 = vector.broadcast %cst_50 : f32 to vector<2x32xf32>
    %227 = arith.cmpf ogt, %225, %226 : vector<2x32xf32>
    %228 = arith.extui %227 : vector<2x32xi1> to vector<2x32xi32>
    %229 = arith.sitofp %228 : vector<2x32xi32> to vector<2x32xf32>
    %230 = vector.broadcast %13 : vector<1x32xf32> to vector<2x32xf32>
    %231 = arith.mulf %230, %207 : vector<2x32xf32>
    %232 = vector.broadcast %17 : vector<1x32xf32> to vector<2x32xf32>
    %233 = arith.mulf %232, %229 : vector<2x32xf32>
    %234 = arith.addf %231, %233 : vector<2x32xf32>
    %cst_51 = arith.constant 1.000000e+00 : f32
    %235 = vector.broadcast %cst_51 : f32 to vector<2x32xf32>
    %236 = arith.mulf %235, %213 : vector<2x32xf32>
    %237 = arith.subf %234, %236 : vector<2x32xf32>
    %cst_52 = arith.constant 1.000000e+00 : f32
    %238 = vector.broadcast %cst_52 : f32 to vector<2x32xf32>
    %239 = arith.subf %237, %238 : vector<2x32xf32>
    %cst_53 = arith.constant 0.000000e+00 : f32
    %240 = vector.broadcast %cst_53 : f32 to vector<2x32xf32>
    %241 = arith.cmpf ogt, %239, %240 : vector<2x32xf32>
    %242 = arith.extui %241 : vector<2x32xi1> to vector<2x32xi32>
    %243 = arith.sitofp %242 : vector<2x32xi32> to vector<2x32xf32>
    %244 = arith.addf %33, %243 : vector<2x32xf32>
    %245 = vector.extract_strided_slice %32 {offsets = [0, 7, 0], sizes = [2, 1, 32], strides = [1, 1, 1]} : vector<2x8x32xf32> to vector<2x1x32xf32>
    %246 = vector.shape_cast %245 : vector<2x1x32xf32> to vector<2x32xf32>
    %247 = vector.broadcast %7 : vector<1x32xf32> to vector<2x32xf32>
    %248 = arith.mulf %247, %223 : vector<2x32xf32>
    %249 = vector.broadcast %15 : vector<1x32xf32> to vector<2x32xf32>
    %250 = arith.mulf %249, %246 : vector<2x32xf32>
    %251 = arith.addf %248, %250 : vector<2x32xf32>
    %cst_54 = arith.constant 1.000000e+00 : f32
    %252 = vector.broadcast %cst_54 : f32 to vector<2x32xf32>
    %253 = arith.mulf %252, %229 : vector<2x32xf32>
    %254 = arith.subf %251, %253 : vector<2x32xf32>
    %cst_55 = arith.constant 1.000000e+00 : f32
    %255 = vector.broadcast %cst_55 : f32 to vector<2x32xf32>
    %256 = arith.subf %254, %255 : vector<2x32xf32>
    %cst_56 = arith.constant 0.000000e+00 : f32
    %257 = vector.broadcast %cst_56 : f32 to vector<2x32xf32>
    %258 = arith.cmpf ogt, %256, %257 : vector<2x32xf32>
    %259 = arith.extui %258 : vector<2x32xi1> to vector<2x32xi32>
    %260 = arith.sitofp %259 : vector<2x32xi32> to vector<2x32xf32>
    %261 = vector.broadcast %13 : vector<1x32xf32> to vector<2x32xf32>
    %262 = arith.mulf %261, %237 : vector<2x32xf32>
    %263 = vector.broadcast %17 : vector<1x32xf32> to vector<2x32xf32>
    %264 = arith.mulf %263, %260 : vector<2x32xf32>
    %265 = arith.addf %262, %264 : vector<2x32xf32>
    %cst_57 = arith.constant 1.000000e+00 : f32
    %266 = vector.broadcast %cst_57 : f32 to vector<2x32xf32>
    %267 = arith.mulf %266, %243 : vector<2x32xf32>
    %268 = arith.subf %265, %267 : vector<2x32xf32>
    %cst_58 = arith.constant 1.000000e+00 : f32
    %269 = vector.broadcast %cst_58 : f32 to vector<2x32xf32>
    %270 = arith.subf %268, %269 : vector<2x32xf32>
    %cst_59 = arith.constant 0.000000e+00 : f32
    %271 = vector.broadcast %cst_59 : f32 to vector<2x32xf32>
    %272 = arith.cmpf ogt, %270, %271 : vector<2x32xf32>
    %273 = arith.extui %272 : vector<2x32xi1> to vector<2x32xi32>
    %274 = arith.sitofp %273 : vector<2x32xi32> to vector<2x32xf32>
    %275 = arith.addf %244, %274 : vector<2x32xf32>
    %c0_60 = arith.constant 0 : index
    %c0_61 = arith.constant 0 : index
    %276 = vector.load %arg5[%c0_60, %c0_61] : memref<1x32xf32, #tpu.memory_space<vmem>>, vector<1x32xf32>
    %277 = vector.broadcast %276 : vector<1x32xf32> to vector<2x32xf32>
    %278 = arith.mulf %275, %277 : vector<2x32xf32>
    %cst_62 = arith.constant dense<0.000000e+00> : vector<2xf32>
    %279 = vector.multi_reduction <add>, %278, %cst_62 [1] : vector<2x32xf32> to vector<2xf32>
    %280 = vector.shape_cast %279 : vector<2xf32> to vector<2x1xf32>
    %c0_63 = arith.constant 0 : index
    %c0_64 = arith.constant 0 : index
    %281 = vector.load %arg6[%c0_63, %c0_64] : memref<1x1xf32, #tpu.memory_space<vmem>>, vector<1x1xf32>
    %282 = vector.broadcast %281 : vector<1x1xf32> to vector<2x1xf32>
    %283 = arith.addf %280, %282 : vector<2x1xf32>
    %c0_65 = arith.constant 0 : index
    %c0_66 = arith.constant 0 : index
    %284 = vector.load %arg7[%c0_65, %c0_66] : memref<2x1xf32, #tpu.memory_space<vmem>>, vector<2x1xf32>
    tpu.vector_store %arg7[%c0_65, %c0_66], %283 {strides = array<i32>} : memref<2x1xf32, #tpu.memory_space<vmem>>, vector<2x1xf32>,
    return
  }
  func.func @transform_0(%arg0: i32) -> (i32, i32, i32) {
    %c0_i32 = arith.constant 0 : i32
    %c0_i32_0 = arith.constant 0 : i32
    %c0_i32_1 = arith.constant 0 : i32
    return %arg0, %c0_i32, %c0_i32_0 : i32, i32, i32
  }
  func.func @transform_1(%arg0: i32) -> (i32, i32) {
    %c0_i32 = arith.constant 0 : i32
    %c0_i32_0 = arith.constant 0 : i32
    %c0_i32_1 = arith.constant 0 : i32
    return %c0_i32, %c0_i32_0 : i32, i32
  }
  func.func @transform_2(%arg0: i32) -> (i32, i32) {
    %c0_i32 = arith.constant 0 : i32
    %c0_i32_0 = arith.constant 0 : i32
    %c0_i32_1 = arith.constant 0 : i32
    return %c0_i32, %c0_i32_0 : i32, i32
  }
  func.func @transform_3(%arg0: i32) -> (i32, i32) {
    %c0_i32 = arith.constant 0 : i32
    %c0_i32_0 = arith.constant 0 : i32
    %c0_i32_1 = arith.constant 0 : i32
    return %c0_i32, %c0_i32_0 : i32, i32
  }
  func.func @transform_4(%arg0: i32) -> (i32, i32) {
    %c0_i32 = arith.constant 0 : i32
    %c0_i32_0 = arith.constant 0 : i32
    %c0_i32_1 = arith.constant 0 : i32
    return %c0_i32, %c0_i32_0 : i32, i32
  }
  func.func @transform_5(%arg0: i32) -> (i32, i32) {
    %c0_i32 = arith.constant 0 : i32
    %c0_i32_0 = arith.constant 0 : i32
    %c0_i32_1 = arith.constant 0 : i32
    return %c0_i32, %c0_i32_0 : i32, i32
  }
  func.func @transform_6(%arg0: i32) -> (i32, i32) {
    %c0_i32 = arith.constant 0 : i32
    %c0_i32_0 = arith.constant 0 : i32
    return %arg0, %c0_i32 : i32, i32
  }
}

</mosaic_0001>

<bundles_post_ra>
// kernel: tpu_custom_call.1
= control target key start
LH: loop header
LB: loop body
LE: loop exit
PB: predicated region body
PF: predicated region fallthrough
CT: control target
= control target key end

     0   :  { %v338_v0 = vmov 0   ;;  %v339_v3 = vmov 1   ;;  %v54_v12 = vlaneseq  ;;  %vm92_vm0 = vcmask 1041409   ;;  %s484_s0 = inlined_call_operand.vmem [shape: f32[2,8,2], index: 0, kind: input, shape index: {}]   ;;  %s485_s5 = inlined_call_operand.<no memory space> [shape: f32[1,1], index: 5, kind: input, shape index: {}]   ;;  %s486_s2 = inlined_call_operand.vmem [shape: f32[1,32], index: 2, kind: input, shape index: {}]   ;;  %s487_s3 = inlined_call_operand.vmem [shape: f32[1,32], index: 3, kind: input, shape index: {}]   ;;  %s488_s1 = inlined_call_operand.vmem [shape: f32[2,32], index: 1, kind: input, shape index: {}]   ;;  %s489_s4 = inlined_call_operand.vmem [shape: f32[1,32], index: 4, kind: input, shape index: {}]   ;;  %s490_s6 = inlined_call_operand.vmem [shape: f32[2,1], index: 6, kind: output, shape index: {}]  }
   0x1   :  { %328 = vset.pattern.permute.xlu1 %v338_v0  ;;  %326 = vset.pattern.permute.xlu0 %v338_v0  ;;  %v26_v1 = vld [vmem:[%s484_s0 + $0x8] sm:$0xff]  ;;  %v25_v2 = vld [vmem:[%s484_s0] sm:$0xff]  ;;  %v11_v4 = vstv %s485_s5  ;;  %v340_v53 = vmov 0.0  }
   0x2   :  { %51 = vperm.xlu0 %326, %v26_v1   ;;  %46 = vperm.xlu1 %328, %v25_v2   ;;  %12 = vst [vmem:[#allocation2] sm:$0x1] %v11_v4  ;;  %v28_v5 = vld [vmem:[%s486_s2] sm:$0x1]  ;;  %v55_v14 = vshrl.u32 %v54_v12, 7 }
   0x3   :  { %v287_v6 = vmul.f32 -1.442695, %v28_v5  ;;  %v35_v7 = vld [vmem:[%s487_s3] sm:$0x1] }
   0x4   :  { %v288_v8 = vmul.f32 -1.442695, %v35_v7  ;;  %v56_v15 = vsub.s32 0, %v55_v14  ;;  %v70_v16 = vsub.s32 1, %v55_v14  ;;  %v27_v17 = vld [vmem:[%s488_s1] sm:$0x3] }
   0x5   :  { %330 = vpow2.f32 %v287_v6 }
   0x6   :  { %327 = vset.pattern.permute.xlu0 %v339_v3  ;;  %329 = vset.pattern.permute.xlu1 %v339_v3  ;;  %332 = vpow2.f32 %v288_v8  ;;  %v57_v21 = vrot.slane %v27_v17, %v56_v15  ;;  %v71_v22 = vrot.slane %v27_v17, %v70_v16 }
   0x7   :  { %65 = vperm.xlu0 %327, %v26_v1   ;;  %61 = vperm.xlu1 %329, %v25_v2  }
  0x12   :  { %v331_v9 = vpop.eup %330 }
  0x13   :  { %v32_v10 = vadd.f32 1.0, %v331_v9  ;;  %v333_v11 = vpop.eup %332 }
  0x14   :  { %v39_v13 = vadd.f32 1.0, %v333_v11 }
  0x15   :  { %334 = vrcp.f32 %v32_v10 }
  0x16   :  { %336 = vrcp.f32 %v39_v13 }
  0x22   :  { %v335_v20 = vpop.eup %334 }
  0x23   :  { %v42_v23 = vsub.f32 1.0, %v335_v20  ;;  %v394_v30 = vrot.slane %v335_v20, %v56_v15  ;;  %v337_v34 = vpop.eup %336 }
  0x24   :  { %v43_v39 = vsub.f32 1.0, %v337_v34  ;;  %v410_v42 = vrot.slane %v337_v34, %v56_v15 }
  0x25   :  { %v400_v33 = vrot.slane %v42_v23, %v56_v15  ;;  %v82_v36 = vmul.f32 0.0, %v394_v30 }
  0x26   :  { %v414_v46 = vrot.slane %v43_v39, %v56_v15  ;;  %v107_v51 = vmul.f32 0.0, %v410_v42 }
  0x7d   :  { %v52_v18 = vpop.permute.xlu0 %51  ;;  %v47_v19 = vpop.permute.xlu1 %46 }
  0x7e   :  { %v59_v26 = vmul.f32 %v57_v21, %v52_v18  ;;  %v58_v27 = vmul.f32 %v57_v21, %v47_v19 }
  0x82   :  { %v66_v24 = vpop.permute.xlu0 %65  ;;  %v62_v25 = vpop.permute.xlu1 %61 }
  0x83   :  { %v73_v28 = vmul.f32 %v71_v22, %v66_v24  ;;  %v72_v29 = vmul.f32 %v71_v22, %v62_v25 }
  0x85   :  { %v396_v31 = vadd.f32 %v73_v28, %v59_v26  ;;  %v398_v32 = vadd.f32 %v72_v29, %v58_v27 }
  0x87   :  { %v91_v35 = vrot.slane %v396_v31, 7  ;;  %v121_v37 = vrot.slane %v398_v32, 1  ;;  %v141_v44 = vrot.slane %v396_v31, 1  ;;  %v140_v45 = vrot.slane %v398_v32, 2 }
  0x88   :  { %v161_v57 = vrot.slane %v396_v31, 2  ;;  %v160_v58 = vrot.slane %v398_v32, 3  ;;  %v181_v1 = vrot.slane %v396_v31, 3  ;;  %v180_v2 = vrot.slane %v398_v32, 4 }
  0x89   :  { %v93_v38 = vsel %vm92_vm0, %v91_v35, %v398_v32  ;;  %v122_v41 = vsel %vm92_vm0, %v396_v31, %v121_v37  ;;  %v142_v52 = vsel %vm92_vm0, %v141_v44, %v140_v45  ;;  %v200_v17 = vrot.slane %v398_v32, 5 }
  0x8a   :  { %v95_v40 = vmul.f32 %v93_v38, %v400_v33  ;;  %v124_v49 = vmul.f32 %v122_v41, %v400_v33  ;;  %v144_v62 = vmul.f32 %v142_v52, %v400_v33  ;;  %v162_v4 = vsel %vm92_vm0, %v161_v57, %v160_v58 }
  0x8b   :  { %v164_v11 = vmul.f32 %v162_v4, %v400_v33  ;;  %v182_v15 = vsel %vm92_vm0, %v181_v1, %v180_v2  ;;  %v201_v18 = vrot.slane %v396_v31, 4  ;;  %v221_v37 = vrot.slane %v396_v31, 5 }
  0x8c   :  { %v96_v43 = vadd.f32 %v95_v40, %v82_v36  ;;  %v184_v23 = vmul.f32 %v182_v15, %v400_v33  ;;  %v220_v36 = vrot.slane %v398_v32, 6 }
  0x8d   :  { %v202_v34 = vsel %vm92_vm0, %v201_v18, %v200_v17 }
  0x8e   :  { %v289_v47 = vadd.f32 -1.0, %v96_v43  ;;  %v120_v48 = vmul.f32 %v96_v43, %v394_v30  ;;  %v204_v43 = vmul.f32 %v202_v34, %v400_v33  ;;  %v321_v34 = vld [vmem:[%s489_s4] ss:$0 sm:$0xff] }
  0x90   :  { %v125_v50 = vadd.f32 %v124_v49, %v120_v48  ;;  %vm98_vm1 = vcmp.gt.f32.partialorder %v289_v47, 0.0 }
  0x91   :  { %v290_v54 = vsel %vm98_vm1, 1.0, %v340_v53  ;;  %vm269_vm1 = vcmask 254976  }
  0x92   :  { %v114_v55 = vmul.f32 %v290_v54, %v414_v46  ;;  %v126_v56 = vsub.f32 %v125_v50, %v290_v54  ;;  %v241_v54 = vrot.slane %v398_v32, 7 }
  0x94   :  { %v115_v59 = vadd.f32 %v114_v55, %v107_v51  ;;  %v293_v60 = vadd.f32 -1.0, %v126_v56  ;;  %v139_v61 = vmul.f32 %v126_v56, %v394_v30  ;;  %v222_v51 = vsel %vm92_vm0, %v221_v37, %v220_v36 }
  0x95   :  { %v242_v55 = vrot.slane %v396_v31, 6 }
  0x96   :  { %v291_v63 = vadd.f32 -1.0, %v115_v59  ;;  %vm128_vm2 = vcmp.gt.f32.partialorder %v293_v60, 0.0  ;;  %v145_v0 = vadd.f32 %v144_v62, %v139_v61  ;;  %v131_v5 = vmul.f32 %v115_v59, %v410_v42 }
  0x97   :  { %v294_v3 = vsel %vm128_vm2, 1.0, %v340_v53  ;;  %v224_v60 = vmul.f32 %v222_v51, %v400_v33  ;;  %v243_v31 = vsel %vm92_vm0, %v242_v55, %v241_v54  ;;  %vm281_vm2 = vcmask 1024  }
  0x98   :  { %vm117_vm3 = vcmp.gt.f32.partialorder %v291_v63, 0.0  ;;  %v132_v6 = vmul.f32 %v294_v3, %v414_v46  ;;  %v146_v7 = vsub.f32 %v145_v0, %v294_v3 }
  0x99   :  { %v292_v12 = vsel %vm117_vm3, 1.0, %v340_v53 }
  0x9a   :  { %v133_v8 = vadd.f32 %v132_v6, %v131_v5  ;;  %v297_v9 = vadd.f32 -1.0, %v146_v7  ;;  %v159_v10 = vmul.f32 %v146_v7, %v394_v30  ;;  %v245_v7 = vmul.f32 %v243_v31, %v400_v33 }
  0x9c   :  { %v134_v13 = vsub.f32 %v133_v8, %v292_v12  ;;  %vm148_vm4 = vcmp.gt.f32.partialorder %v297_v9, 0.0  ;;  %v165_v14 = vadd.f32 %v164_v11, %v159_v10 }
  0x9d   :  { %v298_v16 = vsel %vm148_vm4, 1.0, %v340_v53 }
  0x9e   :  { %v295_v19 = vadd.f32 -1.0, %v134_v13  ;;  %v151_v20 = vmul.f32 %v134_v13, %v410_v42  ;;  %v152_v21 = vmul.f32 %v298_v16, %v414_v46  ;;  %v166_v22 = vsub.f32 %v165_v14, %v298_v16 }
  0xa0   :  { %vm136_vm5 = vcmp.gt.f32.partialorder %v295_v19, 0.0  ;;  %v153_v24 = vadd.f32 %v152_v21, %v151_v20  ;;  %v301_v25 = vadd.f32 -1.0, %v166_v22  ;;  %v179_v26 = vmul.f32 %v166_v22, %v394_v30 }
  0xa1   :  { %v296_v27 = vsel %vm136_vm5, 1.0, %v340_v53 }
  0xa2   :  { %v154_v28 = vsub.f32 %v153_v24, %v296_v27  ;;  %vm168_vm6 = vcmp.gt.f32.partialorder %v301_v25, 0.0  ;;  %v185_v29 = vadd.f32 %v184_v23, %v179_v26 }
  0xa3   :  { %v302_v35 = vsel %vm168_vm6, 1.0, %v340_v53 }
  0xa4   :  { %v299_v38 = vadd.f32 -1.0, %v154_v28  ;;  %v171_v39 = vmul.f32 %v154_v28, %v410_v42  ;;  %v172_v40 = vmul.f32 %v302_v35, %v414_v46  ;;  %v186_v41 = vsub.f32 %v185_v29, %v302_v35 }
  0xa6   :  { %vm156_vm7 = vcmp.gt.f32.partialorder %v299_v38, 0.0  ;;  %v173_v44 = vadd.f32 %v172_v40, %v171_v39  ;;  %v305_v45 = vadd.f32 -1.0, %v186_v41  ;;  %v199_v47 = vmul.f32 %v186_v41, %v394_v30 }
  0xa7   :  { %v300_v48 = vsel %vm156_vm7, 1.0, %v340_v53 }
  0xa8   :  { %v174_v49 = vsub.f32 %v173_v44, %v300_v48  ;;  %vm188_vm8 = vcmp.gt.f32.partialorder %v305_v45, 0.0  ;;  %v205_v50 = vadd.f32 %v204_v43, %v199_v47 }
  0xa9   :  { %v306_v52 = vsel %vm188_vm8, 1.0, %v340_v53 }
  0xaa   :  { %v303_v56 = vadd.f32 -1.0, %v174_v49  ;;  %v191_v57 = vmul.f32 %v174_v49, %v410_v42  ;;  %v192_v58 = vmul.f32 %v306_v52, %v414_v46  ;;  %v206_v59 = vsub.f32 %v205_v50, %v306_v52 }
  0xac   :  { %vm176_vm9 = vcmp.gt.f32.partialorder %v303_v56, 0.0  ;;  %v193_v61 = vadd.f32 %v192_v58, %v191_v57  ;;  %v309_v62 = vadd.f32 -1.0, %v206_v59  ;;  %v219_v63 = vmul.f32 %v206_v59, %v394_v30 }
  0xad   :  { %v304_v0 = vsel %vm176_vm9, 1.0, %v340_v53 }
  0xae   :  { %v194_v1 = vsub.f32 %v193_v61, %v304_v0  ;;  %vm208_vm10 = vcmp.gt.f32.partialorder %v309_v62, 0.0  ;;  %v225_v32 = vadd.f32 %v224_v60, %v219_v63 }
  0xaf   :  { %v310_v2 = vsel %vm208_vm10, 1.0, %v340_v53 }
  0xb0   :  { %v307_v3 = vadd.f32 -1.0, %v194_v1  ;;  %v211_v4 = vmul.f32 %v194_v1, %v410_v42  ;;  %v212_v5 = vmul.f32 %v310_v2, %v414_v46  ;;  %v226_v6 = vsub.f32 %v225_v32, %v310_v2 }
  0xb2   :  { %vm196_vm11 = vcmp.gt.f32.partialorder %v307_v3, 0.0  ;;  %v213_v8 = vadd.f32 %v212_v5, %v211_v4  ;;  %v313_v9 = vadd.f32 -1.0, %v226_v6  ;;  %v240_v10 = vmul.f32 %v226_v6, %v394_v30 }
  0xb3   :  { %v308_v11 = vsel %vm196_vm11, 1.0, %v340_v53 }
  0xb4   :  { %v214_v12 = vsub.f32 %v213_v8, %v308_v11  ;;  %vm228_vm12 = vcmp.gt.f32.partialorder %v313_v9, 0.0  ;;  %v246_v13 = vadd.f32 %v245_v7, %v240_v10 }
  0xb5   :  { %v314_v14 = vsel %vm228_vm12, 1.0, %v340_v53 }
  0xb6   :  { %v311_v15 = vadd.f32 -1.0, %v214_v12  ;;  %v231_v16 = vmul.f32 %v214_v12, %v410_v42  ;;  %v232_v17 = vmul.f32 %v314_v14, %v414_v46  ;;  %v247_v18 = vsub.f32 %v246_v13, %v314_v14 }
  0xb8   :  { %vm216_vm13 = vcmp.gt.f32.partialorder %v311_v15, 0.0  ;;  %v233_v33 = vadd.f32 %v232_v17, %v231_v16  ;;  %v317_v19 = vadd.f32 -1.0, %v247_v18 }
  0xb9   :  { %v312_v20 = vsel %vm216_vm13, 1.0, %v340_v53 }
  0xba   :  { %v234_v21 = vsub.f32 %v233_v33, %v312_v20  ;;  %vm249_vm14 = vcmp.gt.f32.partialorder %v317_v19, 0.0 }
  0xbb   :  { %v318_v30 = vsel %vm249_vm14, 1.0, %v340_v53 }
  0xbc   :  { %v315_v22 = vadd.f32 -1.0, %v234_v21  ;;  %v252_v23 = vmul.f32 %v234_v21, %v410_v42  ;;  %v253_v24 = vmul.f32 %v318_v30, %v414_v46  ;;  %v322_v42 = vld [vmem:[#allocation2] ss:$0 sm:$0xff] }
  0xbe   :  { %vm236_vm15 = vcmp.gt.f32.partialorder %v315_v22, 0.0  ;;  %v254_v25 = vadd.f32 %v253_v24, %v252_v23 }
  0xbf   :  { %v316_v26 = vsel %vm236_vm15, 1.0, %v340_v53 }
  0xc0   :  { %v255_v27 = vsub.f32 %v254_v25, %v316_v26 }
  0xc2   :  { %v319_v28 = vadd.f32 -1.0, %v255_v27 }
  0xc4   :  { %vm257_vm0 = vcmp.gt.f32.partialorder %v319_v28, 0.0 }
  0xc5   :  { %v320_v29 = vsel %vm257_vm0, 1.0, %v340_v53 }
  0xc6   :  { %v260_v35 = vadd.f32 %v320_v29, %v316_v26 }
  0xc8   :  { %v268_v36 = vmul.f32 %v321_v34, %v260_v35 }
  0xca   :  { %v270_v37 = vsel %vm269_vm1, %v268_v36, 0.0 }
  0xcb   :  { %271 = vadd.xlane.f32.xlu1 %v270_v37 }
 0x154   :  { %v272_v46 = vpop.xlane.xlu1 %271 }
 0x155   :  { %v280_v38 = vadd.f32 %v322_v42, %v272_v46 }
 0x157   :  { %282 = vst.msk [vmem:[%s490_s6] sm:$0x3] %vm281_vm2, %v280_v38 }

</bundles_post_ra>
